<compile_context>
chip_gen: v5e
topology: v5e:2x2
jax: 0.10.0
libtpu: 0.0.40
codegen_flags: <defaults>
</compile_context>

<pallas_src>
import functools

import jax
import jax.numpy as jnp
from jax.experimental import pallas as pl
from jax.experimental.pallas import tpu as pltpu


def _round_up(a, m):
    return (a + m - 1) // m * m


def _cdiv(a, b):
    return -(-a // b)


def _gfn_kernel(max_fs, Lp, x_ref, w_ref, maskb_ref, shift_ref,
                fcw_ref, fcb_ref, out_ref):
    """Fused conv (single K=max_fs*E matmul) + masked max-pool + BN/ReLU + FC.

    x_ref    : (Bt, L_in, E)       bf16  padded input tile
    w_ref    : (max_fs*E, Ftot)    bf16  fused per-tap conv weights (BN scale folded)
    maskb_ref: (Lp, Ftot)          f32   0.0 on valid time steps, -1e30 otherwise
    shift_ref: (1, Ftot)           f32   folded BN shift
    fcw_ref  : (Ftot, NL)          bf16  FC weight (padded)
    fcb_ref  : (1, NL)             f32   FC bias (padded)
    out_ref  : (Bt, NL)            f32
    """
    Bt, _, E = x_ref.shape
    Ftot = w_ref.shape[1]

    x = x_ref[...]                                            # (Bt, L_in, E)
    # In-VMEM unfold: window position l, tap t, channel e -> column t*E + e.
    xu = jnp.concatenate([x[:, t:t + Lp, :] for t in range(max_fs)], axis=2)
    xu = xu.reshape(Bt * Lp, max_fs * E)                      # (Bt*Lp, K)

    # One fused conv matmul over all taps / filter branches, f32 accumulation.
    acc = jnp.dot(xu, w_ref[...],
                  preferred_element_type=jnp.float32)         # (Bt*Lp, Ftot)

    # Additive validity mask (-1e30 on padded/invalid time steps), then pool.
    y = acc.reshape(Bt, Lp, Ftot) + maskb_ref[...][None, :, :]
    pooled = jnp.max(y, axis=1)                               # (Bt, Ftot)

    # BN shift + ReLU hoisted past the max-pool: shift is constant in time and
    # ReLU is monotone, so relu(max_t(z_t) + shift) == max_t(relu(z_t + shift)).
    feat = jnp.maximum(pooled + shift_ref[...], 0.0)          # (Bt, Ftot)

    out = jnp.dot(feat.astype(fcw_ref.dtype), fcw_ref[...],
                  preferred_element_type=jnp.float32)
    out_ref[...] = out + fcb_ref[...]


def gfn_forward(x, conv_ws, bn_params, fc_w, fc_b, filter_sizes,
                eps=1e-5, block_b=None):
    """x: (B, L, E) f32. conv_ws[i]: (F, 1, fs_i, E). bn_params[i]:
    (gamma, beta, running_mean, running_var), each (F,). fc_w:
    (num_labels, F*nfs). fc_b: (num_labels,)."""
    B, L, E = x.shape
    nfs = len(filter_sizes)
    F_ = conv_ws[0].shape[0]
    num_labels = fc_w.shape[0]
    max_fs = max(filter_sizes)
    assert all(fs <= L for fs in filter_sizes), \
        "every filter size must be <= sequence length"

    # bf16 sublane tile is 16: align the conv-output time axis so the per-tap
    # slices and the (Bt, Lp) -> (Bt*Lp) collapse are layout-free.
    Lp = _round_up(L - min(filter_sizes) + 1, 16)
    L_in = Lp + max_fs - 1
    Ftot = nfs * F_
    Ftot_pad = _round_up(Ftot, 128)        # lane-dense filter axis
    NL_pad = _round_up(num_labels, 128)    # lane-dense output store
    K = max_fs * E

    if block_b is None:
        # M = Bt*Lp >= 256 fills the v6e/v7x MXU rows (fine on v5e too);
        # cap at the (16-aligned) batch so tiny batches don't over-pad.
        block_b = min(_round_up(_cdiv(256, Lp), 16), _round_up(B, 16))
    Bt = block_b
    B_pad = _round_up(B, Bt)

    # Input once: zero-padded (batch + seq), bf16 for the MXU.
    x_pad = jnp.zeros((B_pad, L_in, E), jnp.float32).at[:B, :L, :].set(x)
    x_pad = x_pad.astype(jnp.bfloat16)

    # Merge all filter-size branches: fused per-tap weight (BN scale folded),
    # BN shift, and additive time-validity bias.
    w_big = jnp.zeros((max_fs, E, Ftot_pad), jnp.float32)
    shift = jnp.zeros((1, Ftot_pad), jnp.float32)
    mask_bias = jnp.full((Lp, Ftot_pad), -1e30, jnp.float32)
    for i, (fs, w, (gamma, beta, mean, var)) in enumerate(
            zip(filter_sizes, conv_ws, bn_params)):
        inv = gamma / jnp.sqrt(var + eps)                        # (F,)
        wf = w.reshape(F_, fs, E) * inv[:, None, None]           # fold BN scale
        for t in range(fs):
            w_big = w_big.at[t, :, i * F_:(i + 1) * F_].set(wf[:, t, :].T)
        shift = shift.at[0, i * F_:(i + 1) * F_].set(beta - mean * inv)
        mask_bias = mask_bias.at[:L - fs + 1, i * F_:(i + 1) * F_].set(0.0)
    # Row ordering t*E + e matches the in-kernel unfold column ordering.
    w_fused = w_big.reshape(K, Ftot_pad).astype(jnp.bfloat16)

    fcw = jnp.zeros((Ftot_pad, NL_pad), jnp.float32)
    fcw = fcw.at[:Ftot, :num_labels].set(fc_w.T).astype(jnp.bfloat16)
    fcb = jnp.zeros((1, NL_pad), jnp.float32).at[0, :num_labels].set(fc_b)

    grid = (B_pad // Bt,)
    flops = 2 * B_pad * Lp * K * Ftot_pad + 2 * B_pad * Ftot_pad * NL_pad
    bytes_accessed = (x_pad.size * 2 + w_fused.size * 2 + fcw.size * 2
                      + (shift.size + mask_bias.size + fcb.size) * 4
                      + B_pad * NL_pad * 4)

    out = pl.pallas_call(
        functools.partial(_gfn_kernel, max_fs, Lp),
        out_shape=jax.ShapeDtypeStruct((B_pad, NL_pad), jnp.float32),
        grid=grid,
        in_specs=[
            pl.BlockSpec((Bt, L_in, E), lambda b: (b, 0, 0)),        # x tile
            pl.BlockSpec((K, Ftot_pad), lambda b: (0, 0)),           # fused conv W (resident)
            pl.BlockSpec((Lp, Ftot_pad), lambda b: (0, 0)),          # time-validity bias
            pl.BlockSpec((1, Ftot_pad), lambda b: (0, 0)),           # BN shift
            pl.BlockSpec((Ftot_pad, NL_pad), lambda b: (0, 0)),      # FC weight
            pl.BlockSpec((1, NL_pad), lambda b: (0, 0)),             # FC bias
        ],
        out_specs=pl.BlockSpec((Bt, NL_pad), lambda b: (b, 0)),
        compiler_params=pltpu.CompilerParams(
            dimension_semantics=("parallel",)),
        cost_estimate=pl.CostEstimate(flops=flops, transcendentals=0,
                                      bytes_accessed=bytes_accessed),
    )(x_pad, w_fused, mask_bias, shift, fcw, fcb)
    return out[:B, :num_labels]


def gfn_reference(x, conv_ws, bn_params, fc_w, fc_b, filter_sizes, eps=1e-5):
    """Pure-JAX f32 reference mirroring the PyTorch forward (eval-mode BN)."""
    B, L, E = x.shape
    pooled = []
    for fs, w, (gamma, beta, mean, var) in zip(filter_sizes, conv_ws, bn_params):
        Lout = L - fs + 1
        F_ = w.shape[0]
        xu = jnp.stack([x[:, t:t + Lout, :] for t in range(fs)], axis=2)
        xu = xu.reshape(B, Lout, fs * E)
        conv = jnp.einsum('blk,fk->blf', xu, w.reshape(F_, fs * E))
        inv = gamma / jnp.sqrt(var + eps)
        y = jnp.maximum(conv * inv + (beta - mean * inv), 0.0)
        pooled.append(jnp.max(y, axis=1))
    feat = jnp.concatenate(pooled, axis=1)
    return feat @ fc_w.T + fc_b


if __name__ == "__main__":
    # Small shapes consistent with the module's forward.
    B, L, E = 2, 16, 32            # batch, seq_len, embed_dim
    num_filters = 8
    filter_sizes = (2, 3, 4)
    num_labels = 4

    key = jax.random.PRNGKey(0)
    keys = jax.random.split(key, 4 * len(filter_sizes) + 3)

    x = jax.random.normal(keys[0], (B, L, E), dtype=jnp.float32)

    conv_ws, bn_params = [], []
    for i, fs in enumerate(filter_sizes):
        kw, kg, kb, km = jax.random.split(keys[1 + i], 4)
        conv_ws.append(0.1 * jax.random.normal(kw, (num_filters, 1, fs, E),
                                               dtype=jnp.float32))
        gamma = 1.0 + 0.1 * jax.random.normal(kg, (num_filters,), dtype=jnp.float32)
        beta = 0.1 * jax.random.normal(kb, (num_filters,), dtype=jnp.float32)
        mean = 0.1 * jax.random.normal(km, (num_filters,), dtype=jnp.float32)
        var = 0.5 + jnp.abs(0.5 * jax.random.normal(
            keys[1 + len(filter_sizes) + i], (num_filters,), dtype=jnp.float32))
        bn_params.append((gamma, beta, mean, var))

    fc_w = 0.1 * jax.random.normal(keys[-2],
                                   (num_labels, num_filters * len(filter_sizes)),
                                   dtype=jnp.float32)
    fc_b = 0.1 * jax.random.normal(keys[-1], (num_labels,), dtype=jnp.float32)

    out = gfn_forward(x, conv_ws, bn_params, fc_w, fc_b, filter_sizes)
    out = jax.block_until_ready(out)

    ref = gfn_reference(x, conv_ws, bn_params, fc_w, fc_b, filter_sizes)
    assert out.shape == (B, num_labels), out.shape
    # bf16 matmul inputs with f32 accumulation -> ~1e-3 level error.
    assert jnp.allclose(out, ref, rtol=2e-2, atol=2e-2), (out, ref)

    print("KERNEL_OK")
</pallas_src>

<mosaic_0001>
module attributes {stable_mosaic.version = 11 : i64} {
  func.func @_gfn_kernel(%arg0: i32, %arg1: memref<16x19x32xbf16, #tpu.memory_space<vmem>>, %arg2: memref<128x128xbf16, #tpu.memory_space<vmem>>, %arg3: memref<16x128xf32, #tpu.memory_space<vmem>>, %arg4: memref<1x128xf32, #tpu.memory_space<vmem>>, %arg5: memref<128x128xbf16, #tpu.memory_space<vmem>>, %arg6: memref<1x128xf32, #tpu.memory_space<vmem>>, %arg7: memref<16x128xf32, #tpu.memory_space<vmem>>) attributes {dimension_semantics = [#tpu.dimension_semantics<parallel>], iteration_bounds = array<i64: 1>, scalar_prefetch = 0 : i64, scratch_operands = 0 : i64, tpu.core_type = #tpu.core_type<tc>, window_params = [{transform_indices = @transform_0, window_bounds = array<i64: 16, 19, 32>}, {pipeline_mode = #tpu.pipeline_mode<synchronous>, transform_indices = @transform_1, window_bounds = array<i64: 128, 128>}, {pipeline_mode = #tpu.pipeline_mode<synchronous>, transform_indices = @transform_2, window_bounds = array<i64: 16, 128>}, {pipeline_mode = #tpu.pipeline_mode<synchronous>, transform_indices = @transform_3, window_bounds = array<i64: 1, 128>}, {pipeline_mode = #tpu.pipeline_mode<synchronous>, transform_indices = @transform_4, window_bounds = array<i64: 128, 128>}, {pipeline_mode = #tpu.pipeline_mode<synchronous>, transform_indices = @transform_5, window_bounds = array<i64: 1, 128>}, {transform_indices = @transform_6, window_bounds = array<i64: 16, 128>}]} {
    %c0 = arith.constant 0 : index
    %c0_0 = arith.constant 0 : index
    %c0_1 = arith.constant 0 : index
    %0 = vector.load %arg1[%c0, %c0_0, %c0_1] : memref<16x19x32xbf16, #tpu.memory_space<vmem>>, vector<16x19x32xbf16>
    %1 = vector.extract_strided_slice %0 {offsets = [0, 0, 0], sizes = [16, 16, 32], strides = [1, 1, 1]} : vector<16x19x32xbf16> to vector<16x16x32xbf16>
    %2 = vector.extract_strided_slice %0 {offsets = [0, 1, 0], sizes = [16, 16, 32], strides = [1, 1, 1]} : vector<16x19x32xbf16> to vector<16x16x32xbf16>
    %3 = vector.extract_strided_slice %0 {offsets = [0, 2, 0], sizes = [16, 16, 32], strides = [1, 1, 1]} : vector<16x19x32xbf16> to vector<16x16x32xbf16>
    %4 = vector.extract_strided_slice %0 {offsets = [0, 3, 0], sizes = [16, 16, 32], strides = [1, 1, 1]} : vector<16x19x32xbf16> to vector<16x16x32xbf16>
    %5 = tpu.concatenate %1, %2, %3, %4 in 2 : vector<16x16x32xbf16>, vector<16x16x32xbf16>, vector<16x16x32xbf16>, vector<16x16x32xbf16> -> vector<16x16x128xbf16>
    %6 = vector.shape_cast %5 : vector<16x16x128xbf16> to vector<256x128xbf16>
    %c0_2 = arith.constant 0 : index
    %c0_3 = arith.constant 0 : index
    %7 = vector.load %arg2[%c0_2, %c0_3] : memref<128x128xbf16, #tpu.memory_space<vmem>>, vector<128x128xbf16>
    %cst = arith.constant dense<0.000000e+00> : vector<256x128xf32>
    %8 = tpu.matmul %6, %7, %cst {dimension_numbers = #tpu.dot_dimension_numbers<[1], [0], [0], [1], [0, 0, 1, 1], [], []>} : vector<256x128xbf16>, vector<128x128xbf16>, vector<256x128xf32> -> vector<256x128xf32>
    %9 = vector.shape_cast %8 : vector<256x128xf32> to vector<16x16x128xf32>
    %c0_4 = arith.constant 0 : index
    %c0_5 = arith.constant 0 : index
    %10 = vector.load %arg3[%c0_4, %c0_5] : memref<16x128xf32, #tpu.memory_space<vmem>>, vector<16x128xf32>
    %11 = vector.shape_cast %10 : vector<16x128xf32> to vector<1x16x128xf32>
    %12 = vector.broadcast %11 : vector<1x16x128xf32> to vector<16x16x128xf32>
    %13 = arith.addf %9, %12 : vector<16x16x128xf32>
    %cst_6 = arith.constant dense<0xFF800000> : vector<16x128xf32>
    %14 = vector.multi_reduction <maximumf>, %13, %cst_6 [1] : vector<16x16x128xf32> to vector<16x128xf32>
    %c0_7 = arith.constant 0 : index
    %c0_8 = arith.constant 0 : index
    %15 = vector.load %arg4[%c0_7, %c0_8] : memref<1x128xf32, #tpu.memory_space<vmem>>, vector<1x128xf32>
    %16 = vector.broadcast %15 : vector<1x128xf32> to vector<16x128xf32>
    %17 = arith.addf %14, %16 : vector<16x128xf32>
    %cst_9 = arith.constant 0.000000e+00 : f32
    %18 = vector.broadcast %cst_9 : f32 to vector<16x128xf32>
    %19 = arith.maximumf %17, %18 : vector<16x128xf32>
    %20 = arith.truncf %19 : vector<16x128xf32> to vector<16x128xbf16>
    %c0_10 = arith.constant 0 : index
    %c0_11 = arith.constant 0 : index
    %21 = vector.load %arg5[%c0_10, %c0_11] : memref<128x128xbf16, #tpu.memory_space<vmem>>, vector<128x128xbf16>
    %cst_12 = arith.constant dense<0.000000e+00> : vector<16x128xf32>
    %22 = tpu.matmul %20, %21, %cst_12 {dimension_numbers = #tpu.dot_dimension_numbers<[1], [0], [0], [1], [0, 0, 1, 1], [], []>} : vector<16x128xbf16>, vector<128x128xbf16>, vector<16x128xf32> -> vector<16x128xf32>
    %c0_13 = arith.constant 0 : index
    %c0_14 = arith.constant 0 : index
    %23 = vector.load %arg6[%c0_13, %c0_14] : memref<1x128xf32, #tpu.memory_space<vmem>>, vector<1x128xf32>
    %24 = vector.broadcast %23 : vector<1x128xf32> to vector<16x128xf32>
    %25 = arith.addf %22, %24 : vector<16x128xf32>
    %c0_15 = arith.constant 0 : index
    %c0_16 = arith.constant 0 : index
    %26 = vector.load %arg7[%c0_15, %c0_16] : memref<16x128xf32, #tpu.memory_space<vmem>>, vector<16x128xf32>
    tpu.vector_store %arg7[%c0_15, %c0_16], %25 {strides = array<i32>} : memref<16x128xf32, #tpu.memory_space<vmem>>, vector<16x128xf32>,
    return
  }
  func.func @transform_0(%arg0: i32) -> (i32, i32, i32) {
    %c0_i32 = arith.constant 0 : i32
    %c0_i32_0 = arith.constant 0 : i32
    %c0_i32_1 = arith.constant 0 : i32
    return %arg0, %c0_i32, %c0_i32_0 : i32, i32, i32
  }
  func.func @transform_1(%arg0: i32) -> (i32, i32) {
    %c0_i32 = arith.constant 0 : i32
    %c0_i32_0 = arith.constant 0 : i32
    %c0_i32_1 = arith.constant 0 : i32
    return %c0_i32, %c0_i32_0 : i32, i32
  }
  func.func @transform_2(%arg0: i32) -> (i32, i32) {
    %c0_i32 = arith.constant 0 : i32
    %c0_i32_0 = arith.constant 0 : i32
    %c0_i32_1 = arith.constant 0 : i32
    return %c0_i32, %c0_i32_0 : i32, i32
  }
  func.func @transform_3(%arg0: i32) -> (i32, i32) {
    %c0_i32 = arith.constant 0 : i32
    %c0_i32_0 = arith.constant 0 : i32
    %c0_i32_1 = arith.constant 0 : i32
    return %c0_i32, %c0_i32_0 : i32, i32
  }
  func.func @transform_4(%arg0: i32) -> (i32, i32) {
    %c0_i32 = arith.constant 0 : i32
    %c0_i32_0 = arith.constant 0 : i32
    %c0_i32_1 = arith.constant 0 : i32
    return %c0_i32, %c0_i32_0 : i32, i32
  }
  func.func @transform_5(%arg0: i32) -> (i32, i32) {
    %c0_i32 = arith.constant 0 : i32
    %c0_i32_0 = arith.constant 0 : i32
    %c0_i32_1 = arith.constant 0 : i32
    return %c0_i32, %c0_i32_0 : i32, i32
  }
  func.func @transform_6(%arg0: i32) -> (i32, i32) {
    %c0_i32 = arith.constant 0 : i32
    %c0_i32_0 = arith.constant 0 : i32
    return %arg0, %c0_i32 : i32, i32
  }
}

</mosaic_0001>

<bundles_post_ra>
// kernel: tpu_custom_call.1
= control target key start
LH: loop header
LB: loop body
LE: loop exit
PB: predicated region body
PF: predicated region fallthrough
CT: control target
= control target key end

     0   :  { %vm425_vm0 = vcmask 1046528   ;;  %vm200_vm1 = vsmask.f32 7424  ;;  %s2067_s0 = inlined_call_operand.vmem [shape: bf16[16,19,32], index: 0, kind: input, shape index: {}]   ;;  %s2068_s1 = inlined_call_operand.vmem [shape: bf16[128,128], index: 1, kind: input, shape index: {}]   ;;  %s2069_s2 = inlined_call_operand.vmem [shape: f32[16,128], index: 2, kind: input, shape index: {}]   ;;  %s2070_s3 = inlined_call_operand.vmem [shape: f32[1,128], index: 3, kind: input, shape index: {}]   ;;  %s2071_s4 = inlined_call_operand.vmem [shape: bf16[128,128], index: 4, kind: input, shape index: {}]   ;;  %s2072_s5 = inlined_call_operand.vmem [shape: f32[1,128], index: 5, kind: input, shape index: {}]   ;;  %s2073_s6 = inlined_call_operand.hbm [shape: f32[16,128], index: 6, kind: output, shape index: {}]  }
   0x1   :  { %v1582_v0 = vld [vmem:[%s2067_s0 + $0x48] sm:$0xff]  ;;  %v44_v1 = vld [vmem:[%s2067_s0 + $0x50] sm:$0x3]  ;;  %v47_v8 = vld [vmem:[%s2067_s0 + $0x5c] sm:$0x3] }
   0x2   :  { %v1590_v2 = vld [vmem:[%s2067_s0 + $0x84] sm:$0xff]  ;;  %v174_v3 = vunpack.c.l.b16 %v44_v1  ;;  %v59_v4 = vld [vmem:[%s2067_s0 + $0x8c] sm:$0x3]  ;;  %v444_v10 = vrot.slane %v1582_v0, 1  ;;  %v274_v11 = vshrl.u32 %v1582_v0, 16  ;;  %v276_v12 = vshll.u32 %v1582_v0, 16 }
   0x3   :  { %v179_v5 = vunpack.c.l.b16 %v59_v4  ;;  %v334_v6 = vshrl.u32 %v1590_v2, 16  ;;  %v336_v7 = vshll.u32 %v1590_v2, 16  ;;  %v1606_v18 = vld [vmem:[%s2067_s0 + $0x54] sm:$0xff]  ;;  %v175_v19 = vunpack.c.l.b16 %v47_v8 }
   0x4   :  { %v190_v9 = vpack.c.b16 %v174_v3, %v174_v3  ;;  %v278_v16 = vrot.slane %v276_v12, 1  ;;  %v561_v25 = vrot.slane %v274_v11, 1  ;;  %v562_v26 = vrot.slane %v276_v12, 2 }
   0x5   :  { %v195_v13 = vpack.c.b16 %v179_v5, %v179_v5  ;;  %v338_v14 = vrot.slane %v336_v7, 1 }
   0x6   :  { %v445_v15 = vrot.slane %v190_v9, 1  ;;  %v281_v17 = vshll.u32 %v190_v9, 16  ;;  %v564_v22 = vshrl.u32 %v190_v9, 16  ;;  %v279_v24 = vor.u32 %v278_v16, %v274_v11 }
   0x7   :  { %v339_v20 = vor.u32 %v338_v14, %v334_v6  ;;  %v341_v21 = vshll.u32 %v195_v13, 16 }
   0x8   :  { %v446_v23 = vsel %vm425_vm0, %v444_v10, %v445_v15 }
   0x9   :  { %11 = vsyncpa [#allocation3], 0  ;;  %s1538_s9 = smov 64   ;;  %v343_v27 = vrot.slane %v341_v21, 1  ;;  %v283_v28 = vrot.slane %v281_v17, 1  ;;  %v566_v29 = vrot.slane %v564_v22, 1  ;;  %v191_v31 = vpack.c.b16 %v175_v19, %v175_v19 }
   0xa   :  { %486 = vrot.lane.b32.xlu0 %v446_v23, %s1538_s9  ;;  %v567_v30 = vrot.slane %v281_v17, 2  ;;  %v288_v32 = vshll.u32 %v1606_v18, 16  ;;  %v459_v33 = vrot.slane %v1590_v2, 1  ;;  %v62_v35 = vld [vmem:[%s2067_s0 + $0x98] sm:$0x3]  ;;  %s1539_s12 = smov 32   ;;  %v563_v38 = vor.u32 %v562_v26, %v561_v25 }
   0xb   :  { %v344_v34 = vsel %vm200_vm1, %v339_v20, %v343_v27  ;;  %vm506_vm2 = vsmask.f32 6400  ;;  %v460_v36 = vrot.slane %v195_v13, 1  ;;  %v284_v37 = vsel %vm200_vm1, %v279_v24, %v283_v28  ;;  %v1622_v41 = vld [vmem:[%s2067_s0 + $0x90] sm:$0xff]  ;;  %v26_v58 = vld [vmem:[%s2067_s0 + $0x8] sm:$0x3] }
   0xc   :  { %415 = vrot.lane.b32.xlu1 %v344_v34, %s1539_s12  ;;  %v568_v39 = vor.u32 %v567_v30, %v566_v29  ;;  %v286_v40 = vshrl.u32 %v1606_v18, 16  ;;  %v290_v42 = vrot.slane %v288_v32, 1  ;;  %v293_v43 = vshll.u32 %v191_v31, 16  ;;  %s1540_s17 = smov 96   ;;  %v1643_v15 = vld [vmem:[%s2067_s0] sm:$0xff]  ;;  %s1541_s8 = smov [#allocation2]  }
   0xd   :  { %v461_v44 = vsel %vm425_vm0, %v459_v33, %v460_v36  ;;  %v180_v45 = vunpack.c.l.b16 %v62_v35  ;;  %v606_v46 = vrot.slane %v334_v6, 1  ;;  %v607_v47 = vrot.slane %v336_v7, 2  ;;  %v50_v19 = vld [vmem:[%s2067_s0 + $0x68] sm:$0x3]  ;;  %s1306_s10 = sshll.u32 %s1541_s8, 4  ;;  %s1308_s14 = sshll.u32 %s2073_s6, 4  ;;  %s1307_s10 = int_to_ptr.vmem [resolvable:$true] %s1306_s10  ;;  %s1309_s14 = int_to_ptr.hbm [resolvable:$true] %s1308_s14 }
   0xe   :  { %496 = vrot.lane.b32.xlu2 %v461_v44, %s1538_s9  ;;  %v609_v48 = vshrl.u32 %v195_v13, 16  ;;  %v612_v49 = vrot.slane %v341_v21, 2  ;;  %v569_v50 = vsel %vm506_vm2, %v563_v38, %v568_v39  ;;  %v348_v51 = vshll.u32 %v1622_v41, 16 }
   0xf   :  { %v608_v52 = vor.u32 %v607_v47, %v606_v46  ;;  %v291_v54 = vor.u32 %v290_v42, %v286_v40  ;;  %v295_v55 = vrot.slane %v293_v43, 1  ;;  %v196_v56 = vpack.c.b16 %v180_v45, %v180_v45 }
  0x10   :  { %v611_v53 = vrot.slane %v609_v48, 1  ;;  %v447_v59 = vrot.slane %v1606_v18, 1  ;;  %v448_v60 = vrot.slane %v191_v31, 1  ;;  %v346_v61 = vshrl.u32 %v1622_v41, 16 }
  0x11   :  { %v350_v62 = vrot.slane %v348_v51, 1  ;;  %v296_v1 = vsel %vm200_vm1, %v291_v54, %v295_v55  ;;  %v353_v3 = vshll.u32 %v196_v56, 16  ;;  %v168_v4 = vunpack.c.l.b16 %v26_v58  ;;  %v1674_v55 = vld [vmem:[%s2067_s0 + $0x9c] sm:$0xff] }
  0x12   :  { %405 = vrot.lane.b32.xlu0 %v284_v37, %s1539_s12  ;;  %v613_v57 = vor.u32 %v612_v49, %v611_v53  ;;  %v570_v5 = vrot.slane %v286_v40, 1  ;;  %v571_v6 = vrot.slane %v288_v32, 2  ;;  %v573_v7 = vshrl.u32 %v191_v31, 16  ;;  %v1657_v31 = vld [vmem:[%s2067_s0 + $0x60] sm:$0xff] }
  0x13   :  { %v576_v8 = vrot.slane %v293_v43, 2  ;;  %v449_v9 = vsel %vm425_vm0, %v447_v59, %v448_v60  ;;  %v351_v12 = vor.u32 %v350_v62, %v346_v61  ;;  %v355_v13 = vrot.slane %v353_v3, 1  ;;  %v65_v43 = vld [vmem:[%s2067_s0 + $0xa4] sm:$0x3] }
  0x14   :  { %663 = vrot.lane.b32.xlu1 %v569_v50, %s1540_s17  ;;  %v614_v63 = vsel %vm506_vm2, %v608_v52, %v613_v57  ;;  %v572_v10 = vor.u32 %v571_v6, %v570_v5  ;;  %v575_v11 = vrot.slane %v573_v7, 1  ;;  %v618_v14 = vshrl.u32 %v196_v56, 16 }
  0x15   :  { %v184_v16 = vpack.c.b16 %v168_v4, %v168_v4  ;;  %v462_v17 = vrot.slane %v1622_v41, 1  ;;  %v463_v21 = vrot.slane %v196_v56, 1  ;;  %v202_v22 = vshrl.u32 %v1643_v15, 16 }
  0x16   :  { %673 = vrot.lane.b32.xlu2 %v614_v63, %s1540_s17  ;;  %v577_v20 = vor.u32 %v576_v8, %v575_v11  ;;  %v204_v23 = vshll.u32 %v1643_v15, 16  ;;  %v615_v25 = vrot.slane %v346_v61, 1  ;;  %v616_v26 = vrot.slane %v348_v51, 2 }
  0x17   :  { %v209_v24 = vshll.u32 %v184_v16, 16  ;;  %v621_v27 = vrot.slane %v353_v3, 2  ;;  %v356_v29 = vsel %vm200_vm1, %v351_v12, %v355_v13  ;;  %v620_v30 = vrot.slane %v618_v14, 1  ;;  %v29_v3 = vld [vmem:[%s2067_s0 + $0x14] sm:$0x3] }
  0x18   :  { %v578_v28 = vsel %vm506_vm2, %v572_v10, %v577_v20  ;;  %v176_v32 = vunpack.c.l.b16 %v50_v19  ;;  %v206_v33 = vrot.slane %v204_v23, 1  ;;  %v464_v36 = vsel %vm425_vm0, %v462_v17, %v463_v21 }
  0x19   :  { %v211_v35 = vrot.slane %v209_v24, 1  ;;  %v617_v37 = vor.u32 %v616_v26, %v615_v25  ;;  %v622_v38 = vor.u32 %v621_v27, %v620_v30  ;;  %v300_v40 = vshll.u32 %v1657_v31, 16  ;;  %v53_v27 = vld [vmem:[%s2067_s0 + $0x74] sm:$0x3] }
  0x1a   :  { %407 = vrot.lane.b32.xlu0 %v296_v1, %s1539_s12  ;;  %v207_v34 = vor.u32 %v206_v33, %v202_v22  ;;  %v192_v39 = vpack.c.b16 %v176_v32, %v176_v32  ;;  %v510_v42 = vshrl.u32 %v184_v16, 16  ;;  %v507_v44 = vrot.slane %v202_v22, 1 }
  0x1b   :  { %v508_v45 = vrot.slane %v204_v23, 2  ;;  %v513_v46 = vrot.slane %v209_v24, 2  ;;  %v426_v49 = vrot.slane %v1643_v15, 1  ;;  %v427_v50 = vrot.slane %v184_v16, 1  ;;  %v1691_v16 = vld [vmem:[%s2067_s0 + $0xc] sm:$0xff] }
  0x1c   :  { %488 = vrot.lane.b32.xlu1 %v449_v9, %s1538_s9  ;;  %v212_v47 = vsel %vm200_vm1, %v207_v34, %v211_v35  ;;  %v512_v48 = vrot.slane %v510_v42, 1  ;;  %v298_v51 = vshrl.u32 %v1657_v31, 16  ;;  %v623_v52 = vsel %vm506_vm2, %v617_v37, %v622_v38 }
  0x1d   :  { %v302_v53 = vrot.slane %v300_v40, 1  ;;  %v305_v54 = vshll.u32 %v192_v39, 16  ;;  %v181_v56 = vunpack.c.l.b16 %v65_v43  ;;  %v509_v57 = vor.u32 %v508_v45, %v507_v44 }
  0x1e   :  { %665 = vrot.lane.b32.xlu2 %v578_v28, %s1540_s17  ;;  %v514_v58 = vor.u32 %v513_v46, %v512_v48  ;;  %v582_v59 = vshrl.u32 %v192_v39, 16  ;;  %v428_v60 = vsel %vm425_vm0, %v426_v49, %v427_v50  ;;  %v360_v1 = vshll.u32 %v1674_v55, 16 }
  0x1f   :  { %v303_v61 = vor.u32 %v302_v53, %v298_v51  ;;  %v307_v62 = vrot.slane %v305_v54, 1  ;;  %v197_v63 = vpack.c.b16 %v181_v56, %v181_v56  ;;  %v579_v5 = vrot.slane %v298_v51, 1  ;;  %v68_v51 = vld [vmem:[%s2067_s0 + $0xb0] sm:$0x3] }
  0x20   :  { %v515_v4 = vsel %vm506_vm2, %v509_v57, %v514_v58  ;;  %v580_v6 = vrot.slane %v300_v40, 2  ;;  %v584_v7 = vrot.slane %v582_v59, 1  ;;  %v585_v8 = vrot.slane %v305_v54, 2  ;;  %v1708_v40 = vld [vmem:[%s2067_s0 + $0x6c] sm:$0xff] }
  0x21   :  { %v450_v9 = vrot.slane %v1657_v31, 1  ;;  %v451_v10 = vrot.slane %v192_v39, 1  ;;  %v358_v11 = vshrl.u32 %v1674_v55, 16  ;;  %v308_v12 = vsel %vm200_vm1, %v303_v61, %v307_v62 }
  0x22   :  { %417 = vrot.lane.b32.xlu0 %v356_v29, %s1539_s12  ;;  %v362_v13 = vrot.slane %v360_v1, 1  ;;  %v365_v14 = vshll.u32 %v197_v63, 16  ;;  %v169_v17 = vunpack.c.l.b16 %v29_v3  ;;  %v581_v19 = vor.u32 %v580_v6, %v579_v5 }
  0x23   :  { %v586_v20 = vor.u32 %v585_v8, %v584_v7  ;;  %v216_v21 = vshll.u32 %v1691_v16, 16  ;;  %v452_v22 = vsel %vm425_vm0, %v450_v9, %v451_v10  ;;  %v627_v25 = vshrl.u32 %v197_v63, 16  ;;  %v1471_v10 = vld [vmem:[%s2068_s1 + $0x38] sm:$0xff] }
  0x24   :  { %498 = vrot.lane.b32.xlu1 %v464_v36, %s1538_s9  ;;  %v363_v23 = vor.u32 %v362_v13, %v358_v11  ;;  %v367_v24 = vrot.slane %v365_v14, 1  ;;  %v185_v26 = vpack.c.b16 %v169_v17, %v169_v17  ;;  %v214_v29 = vshrl.u32 %v1691_v16, 16  ;;  %1482 = vmatpush.bf16.msra.mxu3 %v1471_v10 }
  0x25   :  { %v587_v28 = vsel %vm506_vm2, %v581_v19, %v586_v20  ;;  %v218_v30 = vrot.slane %v216_v21, 1  ;;  %v465_v33 = vrot.slane %v1674_v55, 1  ;;  %v466_v34 = vrot.slane %v197_v63, 1  ;;  %1481 = vmatpush.bf16.msra.mxu2 %v1471_v10  ;;  %862 = vmatpush.bf16.msra.mxu0 %v1471_v10 }
  0x26   :  { %393 = vrot.lane.b32.xlu2 %v212_v47, %s1539_s12  ;;  %v221_v32 = vshll.u32 %v185_v26, 16  ;;  %v624_v35 = vrot.slane %v358_v11, 1  ;;  %v625_v36 = vrot.slane %v360_v1, 2  ;;  %v368_v37 = vsel %vm200_vm1, %v363_v23, %v367_v24  ;;  %1480 = vmatpush.bf16.msra.mxu1 %v1471_v10 }
  0x27   :  { %v629_v38 = vrot.slane %v627_v25, 1  ;;  %v630_v39 = vrot.slane %v365_v14, 2  ;;  %v177_v42 = vunpack.c.l.b16 %v53_v27  ;;  %v519_v43 = vshrl.u32 %v185_v26, 16  ;;  %v32_v27 = vld [vmem:[%s2067_s0 + $0x20] sm:$0x3] }
  0x28   :  { %v219_v44 = vor.u32 %v218_v30, %v214_v29  ;;  %v223_v45 = vrot.slane %v221_v32, 1  ;;  %v467_v46 = vsel %vm425_vm0, %v465_v33, %v466_v34  ;;  %v626_v47 = vor.u32 %v625_v36, %v624_v35 }
  0x29   :  { %v631_v48 = vor.u32 %v630_v39, %v629_v38  ;;  %v193_v49 = vpack.c.b16 %v177_v42, %v177_v42  ;;  %v312_v50 = vshll.u32 %v1708_v40, 16  ;;  %v517_v53 = vrot.slane %v216_v21, 2 }
  0x2a   :  { %675 = vrot.lane.b32.xlu0 %v623_v52, %s1540_s17  ;;  %v516_v52 = vrot.slane %v214_v29, 1  ;;  %v521_v54 = vrot.slane %v519_v43, 1  ;;  %v522_v56 = vrot.slane %v221_v32, 2  ;;  %v224_v57 = vsel %vm200_vm1, %v219_v44, %v223_v45  ;;  %v1752_v29 = vld [vmem:[%s2067_s0 + $0x18] sm:$0xff] }
  0x2b   :  { %v429_v58 = vrot.slane %v1691_v16, 1  ;;  %v430_v59 = vrot.slane %v185_v26, 1  ;;  %v182_v61 = vunpack.c.l.b16 %v68_v51  ;;  %v632_v62 = vsel %vm506_vm2, %v626_v47, %v631_v48  ;;  %v38_v43 = vld [vmem:[%s2067_s0 + $0x38] sm:$0x3]  ;;  %v1468_v48 = vld [vmem:[%s2068_s1 + $0x20] sm:$0xff] }
  0x2c   :  { %474 = vrot.lane.b32.xlu1 %v428_v60, %s1538_s9  ;;  %v1723_v60 = vld [vmem:[%s2067_s0 + $0xa8] sm:$0xff]  ;;  %v310_v63 = vshrl.u32 %v1708_v40, 16  ;;  %v314_v1 = vrot.slane %v312_v50, 1  ;;  %v317_v3 = vshll.u32 %v193_v49, 16  ;;  %v523_v5 = vor.u32 %v522_v56, %v521_v54 }
  0x2d   :  { %v591_v6 = vshrl.u32 %v193_v49, 16  ;;  %v431_v7 = vsel %vm425_vm0, %v429_v58, %v430_v59  ;;  %v1730_v8 = vpack.c.b16 %v182_v61, %v182_v61  ;;  %v372_v9 = vshll.u32 %v1723_v60, 16 }
  0x2e   :  { %651 = vrot.lane.b32.xlu2 %v515_v4, %s1540_s17  ;;  %v518_v4 = vor.u32 %v517_v53, %v516_v52  ;;  %v315_v11 = vor.u32 %v314_v1, %v310_v63  ;;  %v453_v13 = vrot.slane %v1708_v40, 1  ;;  %v588_v17 = vrot.slane %v310_v63, 1 }
  0x2f   :  { %v589_v19 = vrot.slane %v312_v50, 2  ;;  %v593_v20 = vrot.slane %v591_v6, 1  ;;  %v594_v21 = vrot.slane %v317_v3, 2  ;;  %v454_v23 = vrot.slane %v193_v49, 1 }
  0x30   :  { %v524_v14 = vsel %vm506_vm2, %v518_v4, %v523_v5  ;;  %v370_v24 = vshrl.u32 %v1723_v60, 16  ;;  %v374_v25 = vrot.slane %v372_v9, 1  ;;  %v377_v26 = vshll.u32 %v1730_v8, 16 }
  0x31   :  { %v170_v30 = vunpack.c.l.b16 %v32_v27  ;;  %v590_v32 = vor.u32 %v589_v19, %v588_v17  ;;  %v595_v33 = vor.u32 %v594_v21, %v593_v20  ;;  %v455_v34 = vsel %vm425_vm0, %v453_v13, %v454_v23  ;;  %v1802_v23 = vld [vmem:[%s2067_s0 + $0x78] sm:$0xff] }
  0x32   :  { %409 = vrot.lane.b32.xlu0 %v308_v12, %s1539_s12  ;;  %v319_v12 = vrot.slane %v317_v3, 1  ;;  %v375_v35 = vor.u32 %v374_v25, %v370_v24  ;;  %v379_v36 = vrot.slane %v377_v26, 1  ;;  %v636_v38 = vshrl.u32 %v1730_v8, 16  ;;  %v1467_v3 = vld [vmem:[%s2068_s1 + $0x18] sm:$0xff] }
  0x33   :  { %v228_v39 = vshll.u32 %v1752_v29, 16  ;;  %v468_v42 = vrot.slane %v1723_v60, 1  ;;  %v469_v44 = vrot.slane %v1730_v8, 1  ;;  %v186_v45 = vpack.c.b16 %v170_v30, %v170_v30 }
  0x34   :  { %490 = vrot.lane.b32.xlu1 %v452_v22, %s1538_s9  ;;  %v1470_v22 = vld [vmem:[%s2068_s1 + $0x30] sm:$0xff]  ;;  %v380_v49 = vsel %vm200_vm1, %v375_v35, %v379_v36  ;;  %v633_v50 = vrot.slane %v370_v24, 1  ;;  %v634_v51 = vrot.slane %v372_v9, 2  ;;  %v639_v52 = vrot.slane %v377_v26, 2  ;;  %v56_v9 = vld [vmem:[%s2067_s0 + $0x80] sm:$0x3] }
  0x35   :  { %1485 = vmatpush.bf16.msra.mxu3 %v1470_v22  ;;  %1484 = vmatpush.bf16.msra.mxu2 %v1470_v22  ;;  %v230_v47 = vrot.slane %v228_v39, 1  ;;  %v638_v53 = vrot.slane %v636_v38, 1  ;;  %v226_v54 = vshrl.u32 %v1752_v29, 16  ;;  %v233_v56 = vshll.u32 %v186_v45, 16  ;;  %v71_v36 = vld [vmem:[%s2067_s0 + $0xbc] sm:$0x3] }
  0x36   :  { %667 = vrot.lane.b32.xlu2 %v587_v28, %s1540_s17  ;;  %v320_v28 = vsel %vm200_vm1, %v315_v11, %v319_v12  ;;  %863 = vmatpush.bf16.msra.mxu0 %v1470_v22  ;;  %v172_v58 = vunpack.c.l.b16 %v38_v43  ;;  %v470_v63 = vsel %vm425_vm0, %v468_v42, %v469_v44  ;;  %v528_v1 = vshrl.u32 %v186_v45, 16 }
  0x37   :  { %1483 = vmatpush.bf16.msra.mxu1 %v1470_v22  ;;  %v231_v59 = vor.u32 %v230_v47, %v226_v54  ;;  %v235_v61 = vrot.slane %v233_v56, 1  ;;  %v635_v4 = vor.u32 %v634_v51, %v633_v50  ;;  %v640_v5 = vor.u32 %v639_v52, %v638_v53  ;;  %v1464_v47 = vld [vmem:[%s2068_s1] sm:$0xff]  ;;  %v1827_v51 = vld [vmem:[%s2067_s0 + $0xb4] sm:$0xff] }
  0x38   :  { %v1785_v6 = vpack.c.b16 %v172_v58, %v172_v58  ;;  %v433_v8 = vrot.slane %v186_v45, 1  ;;  %v525_v17 = vrot.slane %v226_v54, 1  ;;  %v526_v19 = vrot.slane %v228_v39, 2 }
  0x39   :  { %v236_v10 = vsel %vm200_vm1, %v231_v59, %v235_v61  ;;  %v530_v20 = vrot.slane %v528_v1, 1  ;;  %v531_v21 = vrot.slane %v233_v56, 2  ;;  %v641_v22 = vsel %vm506_vm2, %v635_v4, %v640_v5 }
  0x3a   :  { %419 = vrot.lane.b32.xlu0 %v368_v37, %s1539_s12  ;;  %v1469_v37 = vld [vmem:[%s2068_s1 + $0x28] sm:$0xff]  ;;  %v257_v13 = vshll.u32 %v1785_v6, 16  ;;  %v178_v24 = vunpack.c.l.b16 %v56_v9  ;;  %v546_v25 = vshrl.u32 %v1785_v6, 16  ;;  %v527_v30 = vor.u32 %v526_v19, %v525_v17 }
  0x3b   :  { %1488 = vmatpush.bf16.msra.mxu3 %v1469_v37  ;;  %1487 = vmatpush.bf16.msra.mxu2 %v1469_v37  ;;  %v324_v35 = vshll.u32 %v1802_v23, 16  ;;  %v183_v52 = vunpack.c.l.b16 %v71_v36  ;;  %v35_v9 = vld [vmem:[%s2067_s0 + $0x2c] sm:$0x3]  ;;  %vm683_vm3 = vcmask 261120   ;;  %vm716_vm4 = vcmask 523264  }
  0x3c   :  { %500 = vrot.lane.b32.xlu1 %v467_v46, %s1538_s9  ;;  %v596_v46 = vsel %vm506_vm2, %v590_v32, %v595_v33  ;;  %864 = vmatpush.bf16.msra.mxu0 %v1469_v37  ;;  %v259_v27 = vrot.slane %v257_v13, 1  ;;  %v532_v32 = vor.u32 %v531_v21, %v530_v20  ;;  %v1465_v33 = vld [vmem:[%s2068_s1 + $0x8] sm:$0xff]  ;;  %v548_v39 = vrot.slane %v546_v25, 1 }
  0x3d   :  { %1486 = vmatpush.bf16.msra.mxu1 %v1469_v37  ;;  %v549_v42 = vrot.slane %v257_v13, 2  ;;  %v598_v4 = vrot.slane %v324_v35, 2  ;;  %v171_v17 = vunpack.c.l.b16 %v35_v9  ;;  %vm749_vm5 = vcmask 785408  }
  0x3e   :  { %395 = vrot.lane.b32.xlu2 %v224_v57, %s1539_s12  ;;  %v1776_v57 = vld [vmem:[%s2067_s0 + $0x30] sm:$0xff]  ;;  %v533_v44 = vsel %vm506_vm2, %v527_v30, %v532_v32  ;;  %v471_v30 = vrot.slane %v1827_v51, 1  ;;  %vm1202_vm6 = vcmask 1041409   ;;  %vm1205_vm7 = vcmask 1042434  }
  0x3f   :  { %1491 = vmatpush.bf16.msra.mxu3 %v1468_v48  ;;  %1490 = vmatpush.bf16.msra.mxu2 %v1468_v48  ;;  %v250_v11 = vshrl.u32 %v1776_v57, 16  ;;  %v438_v45 = vrot.slane %v1776_v57, 1  ;;  %v550_v54 = vor.u32 %v549_v42, %v548_v39  ;;  %v1861_v42 = vld [vmem:[%s2067_s0 + $0x3c] sm:$0xff]  ;;  %vm1208_vm8 = vcmask 1043459  }
  0x40   :  { %865 = vmatpush.bf16.msra.mxu0 %v1468_v48  ;;  %vm1211_vm9 = vcmask 1044484   ;;  %vm1214_vm10 = vcmask 1045509   ;;  %vm1217_vm11 = vcmask 1046534   ;;  %vm1220_vm12 = vcmask 1047559  }
  0x41   :  { %1489 = vmatpush.bf16.msra.mxu1 %v1468_v48  ;;  %v543_v37 = vrot.slane %v250_v11, 1  ;;  %v322_v48 = vshrl.u32 %v1802_v23, 16 }
  0x42   :  { %677 = vrot.lane.b32.xlu0 %v632_v62, %s1540_s17  ;;  %v252_v62 = vshll.u32 %v1776_v57, 16 }
  0x43   :  { %1494 = vmatpush.bf16.msra.mxu3 %v1467_v3  ;;  %1493 = vmatpush.bf16.msra.mxu2 %v1467_v3 }
  0x44   :  { %476 = vrot.lane.b32.xlu1 %v431_v7, %s1538_s9  ;;  %v432_v7 = vrot.slane %v1752_v29, 1  ;;  %v254_v12 = vrot.slane %v252_v62, 1  ;;  %866 = vmatpush.bf16.msra.mxu0 %v1467_v3  ;;  %v544_v38 = vrot.slane %v252_v62, 2  ;;  %v199_v62 = vpack.c.b16 %v183_v52, %v183_v52 }
  0x45   :  { %1492 = vmatpush.bf16.msra.mxu1 %v1467_v3  ;;  %v597_v3 = vrot.slane %v322_v48, 1 }
  0x46   :  { %653 = vrot.lane.b32.xlu2 %v524_v14, %s1540_s17  ;;  %v1466_v14 = vld [vmem:[%s2068_s1 + $0x10] sm:$0xff]  ;;  %v255_v26 = vor.u32 %v254_v12, %v250_v11  ;;  %v545_v53 = vor.u32 %v544_v38, %v543_v37  ;;  %v382_v11 = vshrl.u32 %v1827_v51, 16  ;;  %v389_v13 = vshll.u32 %v199_v62, 16 }
  0x47   :  { %1497 = vmatpush.bf16.msra.mxu3 %v1466_v14  ;;  %1496 = vmatpush.bf16.msra.mxu2 %v1466_v14  ;;  %v599_v19 = vor.u32 %v598_v4, %v597_v3  ;;  %v472_v32 = vrot.slane %v199_v62, 1 }
  0x48   :  { %867 = vmatpush.bf16.msra.mxu0 %v1466_v14  ;;  %v260_v43 = vsel %vm200_vm1, %v255_v26, %v259_v27  ;;  %v551_v1 = vsel %vm506_vm2, %v545_v53, %v550_v54  ;;  %v391_v26 = vrot.slane %v389_v13, 1  ;;  %v648_v39 = vrot.slane %v389_v13, 2 }
  0x49   :  { %1495 = vmatpush.bf16.msra.mxu1 %v1466_v14  ;;  %v1845_v14 = vld [vmem:[%s2067_s0 + $0x24] sm:$0xff] }
  0x4a   :  { %411 = vrot.lane.b32.xlu0 %v320_v28, %s1539_s12  ;;  %v434_v28 = vsel %vm425_vm0, %v432_v7, %v433_v8  ;;  %v456_v7 = vrot.slane %v1802_v23, 1  ;;  %v240_v27 = vshll.u32 %v1845_v14, 16  ;;  %v435_v3 = vrot.slane %v1845_v14, 1 }
  0x4b   :  { %1500 = vmatpush.bf16.msra.mxu3 %v1465_v33  ;;  %1499 = vmatpush.bf16.msra.mxu2 %v1465_v33 }
  0x4c   :  { %492 = vrot.lane.b32.xlu1 %v455_v34, %s1538_s9  ;;  %v194_v34 = vpack.c.b16 %v178_v24, %v178_v24  ;;  %868 = vmatpush.bf16.msra.mxu0 %v1465_v33  ;;  %v645_v24 = vshrl.u32 %v199_v62, 16  ;;  %v242_v36 = vrot.slane %v240_v27, 1 }
  0x4d   :  { %1498 = vmatpush.bf16.msra.mxu1 %v1465_v33  ;;  %v642_v33 = vrot.slane %v382_v11, 1 }
  0x4e   :  { %669 = vrot.lane.b32.xlu2 %v596_v46, %s1540_s17  ;;  %v439_v46 = vrot.slane %v1785_v6, 1  ;;  %v329_v50 = vshll.u32 %v194_v34, 16  ;;  %v600_v56 = vshrl.u32 %v194_v34, 16  ;;  %v457_v8 = vrot.slane %v194_v34, 1 }
  0x4f   :  { %1503 = vmatpush.bf16.msra.mxu3 %v1464_v47  ;;  %1502 = vmatpush.bf16.msra.mxu2 %v1464_v47  ;;  %v187_v34 = vpack.c.b16 %v171_v17, %v171_v17  ;;  %v647_v38 = vrot.slane %v645_v24, 1 }
  0x50   :  { %v440_v58 = vsel %vm425_vm0, %v438_v45, %v439_v46  ;;  %869 = vmatpush.bf16.msra.mxu0 %v1464_v47  ;;  %v331_v61 = vrot.slane %v329_v50, 1  ;;  %v602_v5 = vrot.slane %v600_v56, 1  ;;  %v603_v6 = vrot.slane %v329_v50, 2 }
  0x51   :  { %1501 = vmatpush.bf16.msra.mxu1 %v1464_v47  ;;  %v458_v21 = vsel %vm425_vm0, %v456_v7, %v457_v8  ;;  %v238_v45 = vshrl.u32 %v1845_v14, 16  ;;  %v245_v46 = vshll.u32 %v187_v34, 16  ;;  %v264_v47 = vshll.u32 %v1861_v42, 16 }
  0x52   :  { %421 = vrot.lane.b32.xlu0 %v380_v49, %s1539_s12  ;;  %v326_v49 = vrot.slane %v324_v35, 1  ;;  %v604_v20 = vor.u32 %v603_v6, %v602_v5  ;;  %v473_v50 = vsel %vm425_vm0, %v471_v30, %v472_v32  ;;  %v649_v53 = vor.u32 %v648_v39, %v647_v38 }
  0x53   :  { %v436_v4 = vrot.slane %v187_v34, 1  ;;  %v534_v5 = vrot.slane %v238_v45, 1  ;;  %v535_v6 = vrot.slane %v240_v27, 2  ;;  %v540_v8 = vrot.slane %v245_v46, 2 }
  0x54   :  { %502 = vrot.lane.b32.xlu1 %v470_v63, %s1538_s9  ;;  %v327_v59 = vor.u32 %v326_v49, %v322_v48  ;;  %v384_v63 = vshll.u32 %v1827_v51, 16  ;;  %v605_v35 = vsel %vm506_vm2, %v599_v19, %v604_v20  ;;  %v243_v48 = vor.u32 %v242_v36, %v238_v45 }
  0x55   :  { %v247_v49 = vrot.slane %v245_v46, 1  ;;  %v536_v17 = vor.u32 %v535_v6, %v534_v5 }
  0x56   :  { %397 = vrot.lane.b32.xlu2 %v236_v10, %s1539_s12  ;;  %v332_v10 = vsel %vm200_vm1, %v327_v59, %v331_v61  ;;  %v386_v12 = vrot.slane %v384_v63, 1  ;;  %v643_v37 = vrot.slane %v384_v63, 2  ;;  %v262_v59 = vshrl.u32 %v1861_v42, 16 }
  0x57   :  { %v266_v61 = vrot.slane %v264_v47, 1  ;;  %v248_v63 = vsel %vm200_vm1, %v243_v48, %v247_v49 }
  0x58   :  { %v387_v25 = vor.u32 %v386_v12, %v382_v11  ;;  %v644_v52 = vor.u32 %v643_v37, %v642_v33  ;;  %v437_v12 = vsel %vm425_vm0, %v435_v3, %v436_v4  ;;  %v552_v24 = vrot.slane %v262_v59, 1 }
  0x59   :  { %v267_v9 = vor.u32 %v266_v61, %v262_v59 }
  0x5a   :  { %679 = vrot.lane.b32.xlu0 %v641_v22, %s1540_s17 }
  0x5c   :  { %478 = vrot.lane.b32.xlu1 %v434_v28, %s1538_s9  ;;  %v41_v28 = vld [vmem:[%s2067_s0 + $0x44] sm:$0x3]  ;;  %s1542_s0 = smov 128  }
  0x5e   :  { %401 = vrot.lane.b32.xlu2 %v260_v43, %s1539_s12  ;;  %v173_v43 = vunpack.c.l.b16 %v41_v28  ;;  %v441_v28 = vrot.slane %v1861_v42, 1 }
  0x60   :  { %v189_v56 = vpack.c.b16 %v173_v43, %v173_v43 }
  0x62   :  { %655 = vrot.lane.b32.xlu0 %v533_v44, %s1540_s17  ;;  %v392_v44 = vsel %vm200_vm1, %v387_v25, %v391_v26  ;;  %v269_v62 = vshll.u32 %v189_v56, 16  ;;  %v555_v11 = vshrl.u32 %v189_v56, 16  ;;  %v553_v25 = vrot.slane %v264_v47, 2 }
  0x63   :  { %v442_v30 = vrot.slane %v189_v56, 1 }
  0x64   :  { %482 = vrot.lane.b32.xlu1 %v440_v58, %s1538_s9  ;;  %v537_v58 = vshrl.u32 %v187_v34, 16  ;;  %v557_v26 = vrot.slane %v555_v11, 1  ;;  %v558_v27 = vrot.slane %v269_v62, 2  ;;  %v554_v36 = vor.u32 %v553_v25, %v552_v24 }
  0x65   :  { %v443_v39 = vsel %vm425_vm0, %v441_v28, %v442_v30 }
  0x66   :  { %659 = vrot.lane.b32.xlu2 %v551_v1, %s1540_s17  ;;  %v650_v1 = vsel %vm506_vm2, %v644_v52, %v649_v53  ;;  %v539_v7 = vrot.slane %v537_v58, 1  ;;  %v559_v37 = vor.u32 %v558_v27, %v557_v26 }
  0x68   :  { %v1849_v22 = vpop.permute.xlu2 %496  ;;  %v541_v19 = vor.u32 %v540_v8, %v539_v7 }
  0x6a   :  { %413 = vrot.lane.b32.xlu0 %v332_v10, %s1539_s12  ;;  %v271_v10 = vrot.slane %v269_v62, 1  ;;  %v542_v33 = vsel %vm506_vm2, %v536_v17, %v541_v19 }
  0x6c   :  { %494 = vrot.lane.b32.xlu1 %v458_v21, %s1538_s9  ;;  %v272_v21 = vsel %vm200_vm1, %v267_v9, %v271_v10 }
  0x6e   :  { %671 = vrot.lane.b32.xlu2 %v605_v35, %s1540_s17 }
  0x70   :  { %v674_v54 = vpop.permute.xlu2 %673 }
  0x72   :  { %423 = vrot.lane.b32.xlu0 %v392_v44, %s1539_s12 }
  0x74   :  { %504 = vrot.lane.b32.xlu1 %v473_v50, %s1538_s9 }
  0x76   :  { %399 = vrot.lane.b32.xlu2 %v248_v63, %s1539_s12 }
  0x78   :  { %v666_v13 = vpop.permute.xlu2 %665 }
  0x7a   :  { %681 = vrot.lane.b32.xlu0 %v650_v1, %s1540_s17 }
  0x7c   :  { %v487_v20 = vpop.permute.xlu0 %486  ;;  %480 = vrot.lane.b32.xlu1 %v437_v12, %s1538_s9 }
  0x7e   :  { %v416_v32 = vpop.permute.xlu1 %415  ;;  %403 = vrot.lane.b32.xlu2 %v272_v21, %s1539_s12 }
  0x7f   :  { %v707_v34 = vsel %vm683_vm3, %v1590_v2, %v416_v32  ;;  %v560_v2 = vsel %vm506_vm2, %v554_v36, %v559_v37 }
  0x80   :  { %v740_v35 = vsel %vm716_vm4, %v707_v34, %v1849_v22  ;;  %v394_v43 = vpop.permute.xlu2 %393 }
  0x81   :  { %v784_v38 = vsel %vm749_vm5, %v740_v35, %v674_v54 }
  0x82   :  { %657 = vrot.lane.b32.xlu0 %v542_v33, %s1540_s17  ;;  %925 = vmatmul.bf16.vlgmr.msra.gmra.mxu3 %v784_v38 }
  0x84   :  { %v406_v44 = vpop.permute.xlu0 %405  ;;  %484 = vrot.lane.b32.xlu1 %v443_v39, %s1538_s9  ;;  %s1543_s9 = smov 8  }
  0x85   :  { %v697_v45 = vsel %vm683_vm3, %v1582_v0, %v406_v44 }
  0x86   :  { %v730_v22 = vsel %vm716_vm4, %v697_v45, %v487_v20  ;;  %v664_v46 = vpop.permute.xlu1 %663  ;;  %661 = vrot.lane.b32.xlu2 %v560_v2, %s1540_s17 }
  0x87   :  { %v769_v47 = vsel %vm749_vm5, %v730_v22, %v664_v46 }
  0x88   :  { %900 = vmatmul.bf16.vlgmr.msra.gmra.mxu2 %v769_v47  ;;  %v652_v48 = vpop.permute.xlu2 %651 }
  0x8c   :  { %v408_v49 = vpop.permute.xlu0 %407 }
  0x8d   :  { %v699_v52 = vsel %vm683_vm3, %v1606_v18, %v408_v49  ;;  %v685_v18 = vsel %vm683_vm3, %v1643_v15, %v394_v43 }
  0x8e   :  { %v489_v50 = vpop.permute.xlu1 %488 }
  0x8f   :  { %v732_v54 = vsel %vm716_vm4, %v699_v52, %v489_v50 }
  0x90   :  { %v668_v53 = vpop.permute.xlu2 %667  ;;  %v772_v58 = vsel %vm749_vm5, %v732_v54, %v666_v13 }
  0x94   :  { %v418_v0 = vpop.permute.xlu0 %417 }
  0x95   :  { %v709_v59 = vsel %vm683_vm3, %v1622_v41, %v418_v0 }
  0x96   :  { %v499_v56 = vpop.permute.xlu1 %498 }
  0x97   :  { %v742_v61 = vsel %vm716_vm4, %v709_v59, %v499_v56 }
  0x98   :  { %905 = vmatmul.bf16.gmra.mxu2 %v772_v58  ;;  %v396_v63 = vpop.permute.xlu2 %395 }
  0x9c   :  { %v676_v62 = vpop.permute.xlu0 %675 }
  0x9d   :  { %v787_v1 = vsel %vm749_vm5, %v742_v61, %v676_v62 }
  0x9e   :  { %930 = vmatmul.bf16.gmra.mxu3 %v787_v1  ;;  %v475_v3 = vpop.permute.xlu1 %474 }
  0x9f   :  { %v718_v4 = vsel %vm716_vm4, %v685_v18, %v475_v3 }
  0xa0   :  { %v751_v5 = vsel %vm749_vm5, %v718_v4, %v652_v48  ;;  %v654_v7 = vpop.permute.xlu2 %653 }
  0xa1   :  { %870 = vmatmul.bf16.vlgmr.msra.gmra.mxu0 %v751_v5 }
  0xa4   :  { %v410_v6 = vpop.permute.xlu0 %409 }
  0xa5   :  { %v701_v41 = vsel %vm683_vm3, %v1657_v31, %v410_v6  ;;  %v687_v31 = vsel %vm683_vm3, %v1691_v16, %v396_v63 }
  0xa6   :  { %v491_v8 = vpop.permute.xlu1 %490 }
  0xa7   :  { %v734_v9 = vsel %vm716_vm4, %v701_v41, %v491_v8  ;;  %v1960_v8 = vld [vmem:[%s2069_s2 + $0x8] sm:$0xff] }
  0xa8   :  { %v775_v10 = vsel %vm749_vm5, %v734_v9, %v668_v53  ;;  %v670_v15 = vpop.permute.xlu2 %669 }
  0xa9   :  { %910 = vmatmul.bf16.gmra.mxu2 %v775_v10 }
  0xac   :  { %v420_v11 = vpop.permute.xlu0 %419 }
  0xad   :  { %v711_v13 = vsel %vm683_vm3, %v1674_v55, %v420_v11 }
  0xae   :  { %v501_v12 = vpop.permute.xlu1 %500 }
  0xaf   :  { %v744_v17 = vsel %vm716_vm4, %v711_v13, %v501_v12 }
  0xb0   :  { %v398_v26 = vpop.permute.xlu2 %397 }
  0xb1   :  { %v689_v43 = vsel %vm683_vm3, %v1752_v29, %v398_v26 }
  0xb4   :  { %v678_v19 = vpop.permute.xlu0 %677 }
  0xb5   :  { %v790_v20 = vsel %vm749_vm5, %v744_v17, %v678_v19 }
  0xb6   :  { %935 = vmatmul.bf16.gmra.mxu3 %v790_v20  ;;  %v477_v21 = vpop.permute.xlu1 %476 }
  0xb7   :  { %v720_v24 = vsel %vm716_vm4, %v687_v31, %v477_v21 }
  0xb8   :  { %v754_v25 = vsel %vm749_vm5, %v720_v24, %v654_v7  ;;  %v402_v34 = vpop.permute.xlu2 %401 }
  0xb9   :  { %875 = vmatmul.bf16.gmra.mxu0 %v754_v25 }
  0xbc   :  { %v412_v27 = vpop.permute.xlu0 %411 }
  0xbd   :  { %v703_v55 = vsel %vm683_vm3, %v1708_v40, %v412_v27 }
  0xbe   :  { %v493_v28 = vpop.permute.xlu1 %492 }
  0xbf   :  { %v736_v30 = vsel %vm716_vm4, %v703_v55, %v493_v28 }
  0xc0   :  { %v778_v32 = vsel %vm749_vm5, %v736_v30, %v670_v15  ;;  %v660_v39 = vpop.permute.xlu2 %659 }
  0xc1   :  { %915 = vmatmul.bf16.gmra.mxu2 %v778_v32 }
  0xc4   :  { %v422_v33 = vpop.permute.xlu0 %421 }
  0xc5   :  { %v713_v35 = vsel %vm683_vm3, %v1723_v60, %v422_v33  ;;  %v693_v60 = vsel %vm683_vm3, %v1776_v57, %v402_v34 }
  0xc6   :  { %v503_v16 = vpop.permute.xlu1 %502 }
  0xc7   :  { %v746_v36 = vsel %vm716_vm4, %v713_v35, %v503_v16 }
  0xc8   :  { %v672_v47 = vpop.permute.xlu2 %671 }
  0xcc   :  { %v680_v37 = vpop.permute.xlu0 %679 }
  0xcd   :  { %v793_v38 = vsel %vm749_vm5, %v746_v36, %v680_v37 }
  0xce   :  { %940 = vmatmul.bf16.gmra.mxu3 %v793_v38  ;;  %v479_v40 = vpop.permute.xlu1 %478 }
  0xcf   :  { %v722_v44 = vsel %vm716_vm4, %v689_v43, %v479_v40 }
  0xd0   :  { %v400_v0 = vpop.permute.xlu2 %399 }
  0xd1   :  { %v691_v63 = vsel %vm683_vm3, %v1845_v14, %v400_v0  ;;  %v1955_v14 = vld [vmem:[%s2069_s2] sm:$0xff] }
  0xd4   :  { %v656_v45 = vpop.permute.xlu0 %655 }
  0xd5   :  { %v757_v2 = vsel %vm749_vm5, %v722_v44, %v656_v45 }
  0xd6   :  { %880 = vmatmul.bf16.gmra.mxu0 %v757_v2  ;;  %v483_v22 = vpop.permute.xlu1 %482 }
  0xd7   :  { %v726_v46 = vsel %vm716_vm4, %v693_v60, %v483_v22 }
  0xd8   :  { %v763_v48 = vsel %vm749_vm5, %v726_v46, %v660_v39  ;;  %v404_v61 = vpop.permute.xlu2 %403 }
  0xd9   :  { %890 = vmatmul.bf16.vlgmr.msra.gmra.mxu1 %v763_v48 }
  0xdc   :  { %v414_v49 = vpop.permute.xlu0 %413 }
  0xdd   :  { %v705_v29 = vsel %vm683_vm3, %v1802_v23, %v414_v49 }
  0xde   :  { %v495_v50 = vpop.permute.xlu1 %494 }
  0xdf   :  { %v738_v52 = vsel %vm716_vm4, %v705_v29, %v495_v50 }
  0xe0   :  { %v781_v53 = vsel %vm749_vm5, %v738_v52, %v672_v47  ;;  %v662_v4 = vpop.permute.xlu2 %661 }
  0xe1   :  { %920 = vmatmul.bf16.gmra.mxu2 %v781_v53 }
  0xe4   :  { %v424_v54 = vpop.permute.xlu0 %423 }
  0xe5   :  { %v715_v56 = vsel %vm683_vm3, %v1827_v51, %v424_v54  ;;  %v695_v51 = vsel %vm683_vm3, %v1861_v42, %v404_v61 }
  0xe6   :  { %v505_v57 = vpop.permute.xlu1 %504 }
  0xe7   :  { %v748_v58 = vsel %vm716_vm4, %v715_v56, %v505_v57  ;;  %v1479_v57 = vld [vmem:[%s2071_s4 + $0x38] sm:$0xff] }
  0xe8   :  { %1286 = vmatpush.bf16.msrb.mxu1 %v1479_v57  ;;  %v1475_v57 = vld [vmem:[%s2071_s4 + $0x18] sm:$0xff] }
  0xec   :  { %v682_v59 = vpop.permute.xlu0 %681 }
  0xed   :  { %v796_v62 = vsel %vm749_vm5, %v748_v58, %v682_v59 }
  0xee   :  { %945 = vmatmul.bf16.gmra.mxu3 %v796_v62  ;;  %v481_v23 = vpop.permute.xlu1 %480 }
  0xef   :  { %v724_v1 = vsel %vm716_vm4, %v691_v63, %v481_v23 }
  0xf4   :  { %v658_v18 = vpop.permute.xlu0 %657 }
  0xf5   :  { %v760_v3 = vsel %vm749_vm5, %v724_v1, %v658_v18 }
  0xf6   :  { %885 = vmatmul.bf16.gmra.mxu0 %v760_v3  ;;  %v485_v5 = vpop.permute.xlu1 %484 }
  0xf7   :  { %v728_v6 = vsel %vm716_vm4, %v695_v51, %v485_v5 }
  0xf8   :  { %v766_v41 = vsel %vm749_vm5, %v728_v6, %v662_v4 }
  0xf9   :  { %895 = vmatmul.bf16.gmra.mxu1 %v766_v41  ;;  %v1478_v41 = vld [vmem:[%s2071_s4 + $0x30] sm:$0xff] }
  0xfa   :  { %1287 = vmatpush.bf16.msrb.mxu1 %v1478_v41 }
 0x105   :  { %v926_v12 = vpop.f32.mrf.mxu3 }
 0x106   :  { %v975_v55 = vadd.f32 %v1955_v14, %v926_v12 }
 0x10b   :  { %v901_v7 = vpop.f32.mrf.mxu2 }
 0x10c   :  { %v965_v42 = vadd.f32 %v1955_v14, %v901_v7 }
 0x10d   :  { %v928_v13 = vpop.f32.mrf.mxu3 }
 0x10e   :  { %v976_v27 = vadd.f32 %v1960_v8, %v928_v13 }
 0x110   :  { %v1062_v30 = vmax.f32 %v975_v55, %v976_v27  ;;  %v1477_v27 = vld [vmem:[%s2071_s4 + $0x28] sm:$0xff] }
 0x111   :  { %1288 = vmatpush.bf16.msrb.mxu1 %v1477_v27 }
 0x112   :  { %v1063_v34 = vrot.slane %v1062_v30, 4 }
 0x113   :  { %v903_v9 = vpop.f32.mrf.mxu2 }
 0x114   :  { %v966_v10 = vadd.f32 %v1960_v8, %v903_v9  ;;  %v1064_v16 = vmax.f32 %v1062_v30, %v1063_v34  ;;  %v1989_v9 = vld [vmem:[%s2070_s3] ss:$0 sm:$0xff] }
 0x116   :  { %v1027_v11 = vmax.f32 %v965_v42, %v966_v10  ;;  %v1065_v39 = vrot.slane %v1064_v16, 2 }
 0x118   :  { %v1028_v40 = vrot.slane %v1027_v11, 4  ;;  %v1066_v22 = vmax.f32 %v1064_v16, %v1065_v39 }
 0x11a   :  { %v1029_v46 = vmax.f32 %v1027_v11, %v1028_v40  ;;  %v1067_v56 = vrot.slane %v1066_v22, 1 }
 0x11b   :  { %v906_v15 = vpop.f32.mrf.mxu2 }
 0x11c   :  { %v967_v43 = vadd.f32 %v1955_v14, %v906_v15  ;;  %v1030_v58 = vrot.slane %v1029_v46, 2  ;;  %v1068_v7 = vmax.f32 %v1066_v22, %v1067_v56 }
 0x11e   :  { %v871_v17 = vpop.f32.mrf.mxu0  ;;  %v1031_v42 = vmax.f32 %v1029_v46, %v1030_v58  ;;  %v1112_v55 = vadd.f32 %v1989_v9, %v1068_v7 }
 0x11f   :  { %v953_v47 = vadd.f32 %v1955_v14, %v871_v17 }
 0x120   :  { %v1032_v30 = vrot.slane %v1031_v42, 1 }
 0x121   :  { %v931_v20 = vpop.f32.mrf.mxu3 }
 0x122   :  { %v977_v63 = vadd.f32 %v1955_v14, %v931_v20 }
 0x123   :  { %v908_v19 = vpop.f32.mrf.mxu2 }
 0x124   :  { %v968_v37 = vadd.f32 %v1960_v8, %v908_v19 }
 0x126   :  { %v873_v31 = vpop.f32.mrf.mxu0  ;;  %v1034_v45 = vmax.f32 %v967_v43, %v968_v37  ;;  %v1476_v43 = vld [vmem:[%s2071_s4 + $0x20] sm:$0xff] }
 0x127   :  { %v954_v2 = vadd.f32 %v1960_v8, %v873_v31  ;;  %1289 = vmatpush.bf16.msrb.mxu1 %v1476_v43 }
 0x128   :  { %v1035_v29 = vrot.slane %v1034_v45, 4 }
 0x129   :  { %v933_v24 = vpop.f32.mrf.mxu3  ;;  %v985_v50 = vmax.f32 %v953_v47, %v954_v2 }
 0x12a   :  { %v978_v59 = vadd.f32 %v1960_v8, %v933_v24  ;;  %v1036_v1 = vmax.f32 %v1034_v45, %v1035_v29  ;;  %v1033_v45 = vmax.f32 %v1031_v42, %v1032_v30  ;;  %v1474_v42 = vld [vmem:[%s2071_s4 + $0x10] sm:$0xff]  ;;  %v1473_v30 = vld [vmem:[%s2071_s4 + $0x8] sm:$0xff] }
 0x12b   :  { %v986_v18 = vrot.slane %v985_v50, 4  ;;  %1290 = vmatpush.bf16.msrb.mxu1 %v1475_v57 }
 0x12c   :  { %v911_v21 = vpop.f32.mrf.mxu2  ;;  %v1069_v10 = vmax.f32 %v977_v63, %v978_v59  ;;  %v1037_v17 = vrot.slane %v1036_v1, 2  ;;  %v1107_v58 = vadd.f32 %v1989_v9, %v1033_v45 }
 0x12d   :  { %v969_v61 = vadd.f32 %v1955_v14, %v911_v21  ;;  %v987_v19 = vmax.f32 %v985_v50, %v986_v18 }
 0x12f   :  { %1291 = vmatpush.bf16.msrb.mxu1 %v1474_v42 }
 0x133   :  { %1292 = vmatpush.bf16.msrb.mxu1 %v1473_v30 }
 0x134   :  { %v913_v26 = vpop.f32.mrf.mxu2 }
 0x135   :  { %v970_v0 = vadd.f32 %v1960_v8, %v913_v26 }
 0x136   :  { %v876_v25 = vpop.f32.mrf.mxu0 }
 0x137   :  { %v955_v62 = vadd.f32 %v1955_v14, %v876_v25  ;;  %v1041_v51 = vmax.f32 %v969_v61, %v970_v0 }
 0x139   :  { %v936_v28 = vpop.f32.mrf.mxu3  ;;  %v1042_v21 = vrot.slane %v1041_v51, 4 }
 0x13a   :  { %v979_v24 = vadd.f32 %v1955_v14, %v936_v28  ;;  %v988_v28 = vrot.slane %v987_v19, 2 }
 0x13e   :  { %v878_v32 = vpop.f32.mrf.mxu0 }
 0x13f   :  { %v956_v54 = vadd.f32 %v1960_v8, %v878_v32  ;;  %v1070_v32 = vrot.slane %v1069_v10, 4 }
 0x141   :  { %v938_v35 = vpop.f32.mrf.mxu3  ;;  %v992_v5 = vmax.f32 %v955_v62, %v956_v54  ;;  %v1071_v2 = vmax.f32 %v1069_v10, %v1070_v32 }
 0x142   :  { %v980_v11 = vadd.f32 %v1960_v8, %v938_v35 }
 0x143   :  { %v993_v25 = vrot.slane %v992_v5, 4  ;;  %v1072_v59 = vrot.slane %v1071_v2, 2 }
 0x144   :  { %v916_v33 = vpop.f32.mrf.mxu2 }
 0x145   :  { %v971_v48 = vadd.f32 %v1955_v14, %v916_v33  ;;  %v1076_v33 = vmax.f32 %v979_v24, %v980_v11  ;;  %v994_v39 = vmax.f32 %v992_v5, %v993_v25  ;;  %v1123_v11 = vmax.f32 %v1107_v58, 0.0 }
 0x147   :  { %v995_v54 = vrot.slane %v994_v39, 2 }
 0x149   :  { %v996_v41 = vmax.f32 %v994_v39, %v995_v54  ;;  %v1472_v39 = vld [vmem:[%s2071_s4] sm:$0xff] }
 0x14a   :  { %1293 = vmatpush.bf16.msrb.mxu1 %v1472_v39 }
 0x14b   :  { %v997_v27 = vrot.slane %v996_v41, 1 }
 0x14c   :  { %v918_v38 = vpop.f32.mrf.mxu2 }
 0x14d   :  { %v972_v60 = vadd.f32 %v1960_v8, %v918_v38  ;;  %v1043_v38 = vmax.f32 %v1041_v51, %v1042_v21 }
 0x14f   :  { %v1048_v52 = vmax.f32 %v971_v48, %v972_v60  ;;  %v1077_v60 = vrot.slane %v1076_v33, 4  ;;  %v1044_v0 = vrot.slane %v1043_v38, 2 }
 0x151   :  { %v941_v49 = vpop.f32.mrf.mxu3  ;;  %v1049_v3 = vrot.slane %v1048_v52, 4  ;;  %v1078_v62 = vmax.f32 %v1076_v33, %v1077_v60  ;;  %v2019_v33 = vpack.c.bf16 %v1123_v11, %v1123_v11 }
 0x152   :  { %v981_v40 = vadd.f32 %v1955_v14, %v941_v49  ;;  %v989_v49 = vmax.f32 %v987_v19, %v988_v28 }
 0x153   :  { %v881_v36 = vpop.f32.mrf.mxu0  ;;  %v1050_v20 = vmax.f32 %v1048_v52, %v1049_v3 }
 0x154   :  { %v957_v6 = vadd.f32 %v1955_v14, %v881_v36  ;;  %v1038_v36 = vmax.f32 %v1036_v1, %v1037_v17  ;;  %v990_v5 = vrot.slane %v989_v49, 1 }
 0x155   :  { %v1051_v37 = vrot.slane %v1050_v20, 2 }
 0x156   :  { %v891_v44 = vpop.f32.mrf.mxu1  ;;  %v991_v25 = vmax.f32 %v989_v49, %v990_v5 }
 0x157   :  { %v961_v26 = vadd.f32 %v1955_v14, %v891_v44  ;;  %v1128_v44 = vmax.f32 %v1112_v55, 0.0  ;;  %v1052_v29 = vmax.f32 %v1050_v20, %v1051_v37 }
 0x159   :  { %v943_v31 = vpop.f32.mrf.mxu3  ;;  %v1144_v56 = vpack.c.bf16 %v1128_v44, %v1128_v44  ;;  %v1053_v3 = vrot.slane %v1052_v29, 1 }
 0x15a   :  { %v982_v34 = vadd.f32 %v1960_v8, %v943_v31 }
 0x15b   :  { %v883_v53 = vpop.f32.mrf.mxu0  ;;  %v1196_v10 = vunpack.c.l.b16 %v1144_v56  ;;  %v1054_v31 = vmax.f32 %v1052_v29, %v1053_v3 }
 0x15c   :  { %v958_v23 = vadd.f32 %v1960_v8, %v883_v53  ;;  %v1083_v22 = vmax.f32 %v981_v40, %v982_v34  ;;  %v1039_v53 = vrot.slane %v1038_v36, 1 }
 0x15d   :  { %v2017_v32 = vrot.slane %v1196_v10, 5  ;;  %v1110_v40 = vadd.f32 %v1989_v9, %v1054_v31 }
 0x15e   :  { %v893_v4 = vpop.f32.mrf.mxu1  ;;  %v999_v12 = vmax.f32 %v957_v6, %v958_v23  ;;  %v1084_v23 = vrot.slane %v1083_v22, 4  ;;  %v1040_v51 = vmax.f32 %v1038_v36, %v1039_v53  ;;  %v1045_v6 = vmax.f32 %v1043_v38, %v1044_v0 }
 0x15f   :  { %v962_v15 = vadd.f32 %v1960_v8, %v893_v4  ;;  %v1126_v57 = vmax.f32 %v1110_v40, 0.0 }
 0x160   :  { %v1000_v16 = vrot.slane %v999_v12, 4  ;;  %v1085_v17 = vmax.f32 %v1083_v22, %v1084_v23  ;;  %v1108_v24 = vadd.f32 %v1989_v9, %v1040_v51  ;;  %v998_v22 = vmax.f32 %v996_v41, %v997_v27 }
 0x161   :  { %v1013_v35 = vmax.f32 %v961_v26, %v962_v15  ;;  %v1046_v26 = vrot.slane %v1045_v6, 1  ;;  %v1142_v42 = vpack.c.bf16 %v1126_v57, %v1126_v57 }
 0x162   :  { %v1001_v46 = vmax.f32 %v999_v12, %v1000_v16  ;;  %v1073_v12 = vmax.f32 %v1071_v2, %v1072_v59  ;;  %v1086_v36 = vrot.slane %v1085_v17, 2  ;;  %v2028_v2 = vadd.f32 %v1989_v9, %v991_v25 }
 0x163   :  { %v1014_v47 = vrot.slane %v1013_v35, 4  ;;  %v1047_v60 = vmax.f32 %v1045_v6, %v1046_v26  ;;  %v1102_v23 = vadd.f32 %v1989_v9, %v998_v22  ;;  %v1194_v27 = vunpack.c.l.b16 %v1142_v42 }
 0x164   :  { %v921_v13 = vpop.f32.mrf.mxu2  ;;  %v1002_v63 = vrot.slane %v1001_v46, 2  ;;  %v1074_v34 = vrot.slane %v1073_v12, 1  ;;  %v1087_v49 = vmax.f32 %v1085_v17, %v1086_v36 }
 0x165   :  { %v973_v50 = vadd.f32 %v1955_v14, %v921_v13  ;;  %v1015_v1 = vmax.f32 %v1013_v35, %v1014_v47  ;;  %v1079_v13 = vrot.slane %v1078_v62, 2  ;;  %v1124_v47 = vmax.f32 %v1108_v24, 0.0 }
 0x166   :  { %v1003_v19 = vmax.f32 %v1001_v46, %v1002_v63  ;;  %v1088_v6 = vrot.slane %v1087_v49, 1  ;;  %v1222_v22 = vrot.slane %v1194_v27, 7 }
 0x167   :  { %v1016_v20 = vrot.slane %v1015_v1, 2  ;;  %v1080_v35 = vmax.f32 %v1078_v62, %v1079_v13  ;;  %v1109_v62 = vadd.f32 %v1989_v9, %v1047_v60  ;;  %v1118_v13 = vmax.f32 %v1102_v23, 0.0 }
 0x168   :  { %v1004_v37 = vrot.slane %v1003_v19, 1  ;;  %v1089_v24 = vmax.f32 %v1087_v49, %v1088_v6 }
 0x169   :  { %v1017_v28 = vmax.f32 %v1015_v1, %v1016_v20  ;;  %v1081_v53 = vrot.slane %v1080_v35, 1  ;;  %v1134_v36 = vpack.c.bf16 %v1118_v13, %v1118_v13 }
 0x16a   :  { %v1005_v0 = vmax.f32 %v1003_v19, %v1004_v37  ;;  %v1125_v19 = vmax.f32 %v1109_v62, 0.0 }
 0x16b   :  { %v1018_v54 = vrot.slane %v1017_v28, 1  ;;  %v1082_v5 = vmax.f32 %v1080_v35, %v1081_v53 }
 0x16c   :  { %v923_v48 = vpop.f32.mrf.mxu2  ;;  %v1103_v41 = vadd.f32 %v1989_v9, %v1005_v0 }
 0x16d   :  { %v974_v52 = vadd.f32 %v1960_v8, %v923_v48 }
 0x16e   :  { %v1119_v25 = vmax.f32 %v1103_v41, 0.0 }
 0x16f   :  { %v1055_v61 = vmax.f32 %v973_v50, %v974_v52 }
 0x171   :  { %v946_v18 = vpop.f32.mrf.mxu3  ;;  %v1056_v4 = vrot.slane %v1055_v61, 4 }
 0x172   :  { %v983_v44 = vadd.f32 %v1955_v14, %v946_v18 }
 0x173   :  { %v886_v7 = vpop.f32.mrf.mxu0  ;;  %v1057_v15 = vmax.f32 %v1055_v61, %v1056_v4  ;;  %v1075_v61 = vmax.f32 %v1073_v12, %v1074_v34 }
 0x174   :  { %v959_v29 = vadd.f32 %v1955_v14, %v886_v7  ;;  %v1019_v7 = vmax.f32 %v1017_v28, %v1018_v54  ;;  %v1141_v28 = vpack.c.bf16 %v1125_v19, %v1125_v19 }
 0x175   :  { %v1058_v21 = vrot.slane %v1057_v15, 2 }
 0x176   :  { %v896_v55 = vpop.f32.mrf.mxu1  ;;  %v1105_v26 = vadd.f32 %v1989_v9, %v1019_v7  ;;  %v1193_v53 = vunpack.c.l.b16 %v1141_v28 }
 0x177   :  { %v1059_v16 = vmax.f32 %v1057_v15, %v1058_v21  ;;  %v963_v63 = vadd.f32 %v1955_v14, %v896_v55  ;;  %v1113_v15 = vadd.f32 %v1989_v9, %v1075_v61  ;;  %v2039_v14 = vpack.c.bf16 %v1124_v47, %v1124_v47 }
 0x178   :  { %v1121_v60 = vmax.f32 %v1105_v26, 0.0  ;;  %v1223_v61 = vsel %vm1202_vm6, %v1222_v22, %v1193_v53 }
 0x179   :  { %v948_v38 = vpop.f32.mrf.mxu3  ;;  %v1060_v43 = vrot.slane %v1059_v16, 1  ;;  %v1129_v35 = vmax.f32 %v1113_v15, 0.0  ;;  %v1191_v15 = vunpack.c.l.b16 %v2019_v33  ;;  %v1192_v27 = vunpack.c.l.b16 %v2039_v14 }
 0x17a   :  { %v984_v45 = vadd.f32 %v1960_v8, %v948_v38 }
 0x17b   :  { %v888_v46 = vpop.f32.mrf.mxu0  ;;  %v1061_v48 = vmax.f32 %v1059_v16, %v1060_v43  ;;  %v1117_v16 = vmax.f32 %v2028_v2, 0.0  ;;  %v1186_v2 = vunpack.c.l.b16 %v1134_v36 }
 0x17c   :  { %v1090_v50 = vmax.f32 %v983_v44, %v984_v45  ;;  %v960_v52 = vadd.f32 %v1960_v8, %v888_v46  ;;  %v1115_v44 = vadd.f32 %v1989_v9, %v1089_v24  ;;  %v1135_v45 = vpack.c.bf16 %v1119_v25, %v1119_v25 }
 0x17d   :  { %v1111_v56 = vadd.f32 %v1989_v9, %v1061_v48 }
 0x17e   :  { %v1091_v58 = vrot.slane %v1090_v50, 4  ;;  %v1006_v59 = vmax.f32 %v959_v29, %v960_v52  ;;  %v898_v1 = vpop.f32.mrf.mxu1  ;;  %v1133_v29 = vpack.c.bf16 %v1117_v16, %v1117_v16  ;;  %v1216_v16 = vrot.slane %v1191_v15, 2 }
 0x17f   :  { %v1127_v18 = vmax.f32 %v1111_v56, 0.0  ;;  %v964_v51 = vadd.f32 %v1960_v8, %v898_v1  ;;  %v1114_v8 = vadd.f32 %v1989_v9, %v1082_v5  ;;  %v1131_v56 = vmax.f32 %v1115_v44, 0.0 }
 0x180   :  { %v1092_v3 = vmax.f32 %v1090_v50, %v1091_v58  ;;  %v1007_v4 = vrot.slane %v1006_v59, 4  ;;  %v1145_v50 = vpack.c.bf16 %v1129_v35, %v1129_v35  ;;  %v1187_v58 = vunpack.c.l.b16 %v1135_v45 }
 0x181   :  { %v1020_v12 = vmax.f32 %v963_v63, %v964_v51  ;;  %v1143_v17 = vpack.c.bf16 %v1127_v18, %v1127_v18  ;;  %v1130_v43 = vmax.f32 %v1114_v8, 0.0  ;;  %v1201_v1 = vrot.slane %v1186_v2, 7 }
 0x182   :  { %v1093_v10 = vrot.slane %v1092_v3, 2  ;;  %v1008_v11 = vmax.f32 %v1006_v59, %v1007_v4  ;;  %v1137_v59 = vpack.c.bf16 %v1121_v60, %v1121_v60  ;;  %v1197_v63 = vunpack.c.l.b16 %v1145_v50 }
 0x183   :  { %v1021_v21 = vrot.slane %v1020_v12, 4  ;;  %v1195_v37 = vunpack.c.l.b16 %v1143_v17  ;;  %v1146_v57 = vpack.c.bf16 %v1130_v43, %v1130_v43  ;;  %v1147_v41 = vpack.c.bf16 %v1131_v56, %v1131_v56  ;;  %v1511_v43 = vld [vmem:[%s2072_s5] ss:$0 sm:$0xff] }
 0x184   :  { %v1094_v20 = vmax.f32 %v1092_v3, %v1093_v10  ;;  %v1009_v31 = vrot.slane %v1008_v11, 2  ;;  %v1185_v3 = vunpack.c.l.b16 %v1133_v29  ;;  %v1204_v7 = vrot.slane %v1187_v58, 6 }
 0x185   :  { %v1022_v34 = vmax.f32 %v1020_v12, %v1021_v21  ;;  %v1224_v52 = vrot.slane %v1195_v37, 6  ;;  %v1198_v6 = vunpack.c.l.b16 %v1146_v57  ;;  %v1189_v42 = vunpack.c.l.b16 %v1137_v59 }
 0x186   :  { %v1095_v55 = vrot.slane %v1094_v20, 1  ;;  %v1010_v30 = vmax.f32 %v1008_v11, %v1009_v31  ;;  %v1228_v13 = vrot.slane %v1197_v63, 4  ;;  %v1203_v17 = vsel %vm1202_vm6, %v1201_v1, %v1185_v3 }
 0x187   :  { %v1023_v40 = vrot.slane %v1022_v34, 2  ;;  %v1225_v18 = vsel %vm1205_vm7, %v1224_v52, %v1223_v61  ;;  %v1210_v21 = vrot.slane %v1189_v42, 4  ;;  %v1206_v8 = vsel %vm1205_vm7, %v1204_v7, %v1203_v17 }
 0x188   :  { %v1096_v38 = vmax.f32 %v1094_v20, %v1095_v55  ;;  %v1011_v39 = vrot.slane %v1010_v30, 1  ;;  %v1227_v12 = vsel %vm1208_vm8, %v2017_v32, %v1225_v18  ;;  %v1230_v25 = vrot.slane %v1198_v6, 3 }
 0x189   :  { %v1024_v48 = vmax.f32 %v1022_v34, %v1023_v40  ;;  %v1229_v24 = vsel %vm1211_vm9, %v1228_v13, %v1227_v12  ;;  %v1219_v37 = vrot.slane %v1192_v27, 1 }
 0x18a   :  { %v1116_v46 = vadd.f32 %v1989_v9, %v1096_v38  ;;  %v1012_v47 = vmax.f32 %v1010_v30, %v1011_v39  ;;  %v1231_v30 = vsel %vm1214_vm10, %v1230_v25, %v1229_v24 }
 0x18b   :  { %v1025_v0 = vrot.slane %v1024_v48, 1 }
 0x18c   :  { %v1104_v49 = vadd.f32 %v1989_v9, %v1012_v47  ;;  %v1132_v54 = vmax.f32 %v1116_v46, 0.0 }
 0x18d   :  { %v1026_v23 = vmax.f32 %v1024_v48, %v1025_v0 }
 0x18e   :  { %v1120_v62 = vmax.f32 %v1104_v49, 0.0  ;;  %v1148_v5 = vpack.c.bf16 %v1132_v54, %v1132_v54 }
 0x18f   :  { %v1106_v51 = vadd.f32 %v1989_v9, %v1026_v23  ;;  %v1199_v9 = vunpack.c.l.b16 %v1147_v41 }
 0x190   :  { %v1136_v4 = vpack.c.bf16 %v1120_v62, %v1120_v62  ;;  %v1200_v31 = vunpack.c.l.b16 %v1148_v5 }
 0x191   :  { %v1122_v11 = vmax.f32 %v1106_v51, 0.0  ;;  %v1232_v35 = vrot.slane %v1199_v9, 2 }
 0x192   :  { %v1188_v10 = vunpack.c.l.b16 %v1136_v4  ;;  %v1234_v34 = vrot.slane %v1200_v31, 1 }
 0x193   :  { %v1138_v20 = vpack.c.bf16 %v1122_v11, %v1122_v11  ;;  %v1233_v38 = vsel %vm1217_vm11, %v1232_v35, %v1231_v30 }
 0x194   :  { %v1207_v19 = vrot.slane %v1188_v10, 5  ;;  %v1235_v40 = vsel %vm1220_vm12, %v1234_v34, %v1233_v38 }
 0x195   :  { %v1190_v26 = vunpack.c.l.b16 %v1138_v20 }
 0x196   :  { %v1209_v32 = vsel %vm1208_vm8, %v1207_v19, %v1206_v8 }
 0x197   :  { %v1212_v33 = vsel %vm1211_vm9, %v1210_v21, %v1209_v32  ;;  %v1213_v55 = vrot.slane %v1190_v26, 3 }
 0x199   :  { %v1215_v36 = vsel %vm1214_vm10, %v1213_v55, %v1212_v33 }
 0x19a   :  { %v1218_v28 = vsel %vm1217_vm11, %v1216_v16, %v1215_v36 }
 0x19b   :  { %v1221_v39 = vsel %vm1220_vm12, %v1219_v37, %v1218_v28 }
 0x19c   :  { %v1236_v14 = vpack.c.b16 %v1235_v40, %v1221_v39 }
 0x19e   :  { %1294 = vmatmul.bf16.vlgmr.msrb.gmra.mxu1 %v1236_v14 }
 0x21b   :  { %v1295_v44 = vpop.f32.mrf.mxu1 }
 0x21c   :  { %v1296_v45 = vadd.f32 %v1511_v43, %v1295_v44 }
 0x21e   :  { %1300 = vst [vmem:[#allocation2] sm:$0xff] %v1296_v45 }
 0x223   :  { %v1297_v60 = vpop.f32.mrf.mxu1 }
 0x224   :  { %v1298_v22 = vadd.f32 %v1511_v43, %v1297_v60 }
 0x226   :  { %1301 = vst [vmem:[#allocation2 + $0x8] sm:$0xff] %v1298_v22 }
 0x227   :  { %1314 = dma.vmem_to_hbm [thread:$0]  %s1307_s10, 256, %s1309_s14, [#allocation3], %s1542_s0, %s1542_s0, %s1543_s9  }
 0x228   :  { %1536 = dma.done.wait [#allocation3], 256  }
 0x229   :  { %1537 = vsyncadd [#allocation3], 4294967040 }
 0x22a   :  { %1319 = vsyncpa [#allocation3], 1 }

</bundles_post_ra>
